<compile_context>
chip_gen: v7x
topology: tpu7x:2x2x1
jax: 0.10.0
libtpu: 0.0.40
codegen_flags: <defaults>
</compile_context>

<pallas_src>
import math

import jax
import jax.numpy as jnp
from jax.experimental import pallas as pl
from jax.experimental.pallas import tpu as pltpu

# ---------------- small, module-consistent config ----------------
B = 2                      # batch
IMG_C, IMG_H, IMG_W = 3, 32, 32
C_BB = 4                   # backbone.num_channels[0]
HIDDEN = 32                # transformer.d_model (== 32 so GroupNorm(32, hidden) has group size 1)
NUM_CLASSES = 8
NUM_Q_O2O = 8              # num_queries_one2one
NUM_Q_O2M = 8              # num_queries_one2many
NUM_Q = NUM_Q_O2O + NUM_Q_O2M
NUM_DEC_LAYERS = 3         # transformer.decoder.num_layers (num_pred, two_stage=False)
FH, FW = IMG_H // 2, IMG_W // 2
HW = FH * FW               # 256 -> lane-dense (multiple of 128)


# ====================================================================
# Pallas kernel 1: input_proj = 1x1 conv (pointwise) + GroupNorm(32, HIDDEN)
#   Layout: NCHW-flat, (sample, channel, HW) with HW on the lane axis.
#   Grid: one sample per step ("parallel" -> shards across TCs on v7x).
#   Params packed into ONE slab: [w^T | bias | gamma | beta] of shape (D, C+3).
# ====================================================================
def input_proj_kernel(x_ref, p_ref, o_ref):
    x = x_ref[0]                                                     # (C, HW)
    p = p_ref[...]                                                   # (D, C+3)
    C = x.shape[0]

    wt = p[:, 0:C]                                                   # (D, C)
    b = p[:, C:C + 1]                                                # (D, 1)
    g = p[:, C + 1:C + 2]                                            # (D, 1)
    beta = p[:, C + 2:C + 3]                                         # (D, 1)

    # 1x1 conv with contraction K == C_BB == 4: C rank-1 VPU accumulates
    # instead of a <1%-utilized MXU matmul (skips MXU fill/drain latency).
    # TODO(synk): for real C_BB (~2048) replace with a K-tiled MXU jnp.dot.
    y = wt[:, 0:1] * x[0:1, :]                                       # (D, HW)
    for k in range(1, C):
        y = y + wt[:, k:k + 1] * x[k:k + 1, :]
    y = y + b

    # GroupNorm(32, HIDDEN) with HIDDEN == 32 -> one channel per group:
    # per-(sample, channel) statistics over the spatial (lane) axis.
    # Single-pass stats (sum + sum-of-squares), variance clamped to >= 0.
    # TODO(synk): real HIDDEN=256 with 32 groups needs intra-group channel
    #             reduction as well; this kernel assumes group size 1.
    inv_hw = 1.0 / y.shape[1]
    s1 = jnp.sum(y, axis=1, keepdims=True)                           # (D, 1)
    s2 = jnp.sum(y * y, axis=1, keepdims=True)                       # (D, 1)
    mean = s1 * inv_hw
    var = jnp.maximum(s2 * inv_hw - mean * mean, 0.0)
    yn = (y - mean) * jax.lax.rsqrt(var + 1e-5)
    o_ref[0] = yn * g + beta


def input_proj(x_ncp, proj_slab):
    """x_ncp: [N, C, HW] f32; proj_slab: [D, C+3] -> [N, D, HW] f32."""
    N, C, HWn = x_ncp.shape
    D = proj_slab.shape[0]

    flops = int(N * HWn * (2 * C * D + 8 * D))
    bytes_accessed = int(4 * (N * C * HWn + D * (C + 3) + N * D * HWn))

    return pl.pallas_call(
        input_proj_kernel,
        out_shape=jax.ShapeDtypeStruct((N, D, HWn), jnp.float32),
        grid=(N,),
        in_specs=[
            pl.BlockSpec((1, C, HWn), lambda n: (n, 0, 0)),
            pl.BlockSpec((D, C + 3), lambda n: (0, 0)),
        ],
        out_specs=pl.BlockSpec((1, D, HWn), lambda n: (n, 0, 0)),
        compiler_params=pltpu.CompilerParams(
            dimension_semantics=("parallel",),
            vmem_limit_bytes=32 * 1024 * 1024),
        cost_estimate=pl.CostEstimate(
            flops=flops, transcendentals=int(N * D), bytes_accessed=bytes_accessed),
    )(x_ncp, proj_slab)


# ====================================================================
# Pallas kernel 2: detection heads for ALL (level, batch, query) rows at once
#   y       = h @ [bbox_w1 | class_w] + [bbox_b1 | class_b]   (fused matmul)
#   logits  = y[:, D:]
#   x1      = relu(y[:, :D]); x2 = relu(x1 @ w2 + b2); tmp = x2 @ w3 + b3
#   coord   = sigmoid(tmp + inverse_sigmoid(reference))
#   Two separate outputs (logits, coords); weights+biases packed into one slab.
#   Row-tiled grid, "parallel".  Valid because class_embed/bbox_embed share
#   parameters across decoder levels (with_box_refine=False).
# ====================================================================
def detection_heads(hs, refs, params, tile_r=32):
    """hs: [L,B,Q,D], refs: [L,B,Q,4] -> (logits [L,B,Q,NC], coords [L,B,Q,4])."""
    L, Bn, Q, D = hs.shape
    NC = params["class_w"].shape[1]
    R = L * Bn * Q

    h2 = hs.reshape(R, D)
    r2 = refs.reshape(R, 4)

    # Pack every head weight/bias into a single parameter slab:
    #   rows 0..D-1 : [ bbox_w1 | class_w | bbox_w2 | bbox_w3 ]
    #   row  D      : [ bbox_b1 | class_b | bbox_b2 | bbox_b3 ]
    # TODO(synk): at real sizes cast h2 / slab to bf16 on v6e/v7x (keep f32 acc).
    wcb = jnp.concatenate([params["bbox_w1"], params["class_w"]], axis=1)      # (D, D+NC)
    bcb = jnp.concatenate([params["bbox_b1"], params["class_b"]], axis=1)      # (1, D+NC)
    wslab = jnp.concatenate([wcb, params["bbox_w2"], params["bbox_w3"]], axis=1)
    bslab = jnp.concatenate([bcb, params["bbox_b2"], params["bbox_b3"]], axis=1)
    pslab = jnp.concatenate([wslab, bslab], axis=0)                            # (D+1, W)
    W = 2 * D + NC + 4

    # Pad rows to a multiple of the tile so the row grid divides evenly.
    tiles = (R + tile_r - 1) // tile_r
    Rp = tiles * tile_r
    if Rp != R:
        h2 = jnp.pad(h2, ((0, Rp - R), (0, 0)))
        r2 = jnp.pad(r2, ((0, Rp - R), (0, 0)))

    def head_kernel(h_ref, r_ref, p_ref, logit_ref, box_ref):
        h = h_ref[...]                                               # (tile_r, D)
        p = p_ref[...]                                               # (D+1, W)
        wcb_k = p[:D, 0:D + NC]
        w2_k = p[:D, D + NC:2 * D + NC]
        w3_k = p[:D, 2 * D + NC:]
        bcb_k = p[D:D + 1, 0:D + NC]
        b2_k = p[D:D + 1, D + NC:2 * D + NC]
        b3_k = p[D:D + 1, 2 * D + NC:]

        # Fused class-head + first bbox-MLP layer: one MXU push instead of two.
        y = jnp.dot(h, wcb_k, preferred_element_type=jnp.float32) + bcb_k
        x1 = jnp.maximum(y[:, :D], 0.0)                              # bbox MLP layer 1
        logits = y[:, D:]                                            # class logits

        x2 = jnp.maximum(
            jnp.dot(x1, w2_k, preferred_element_type=jnp.float32) + b2_k, 0.0)
        tmp = jnp.dot(x2, w3_k, preferred_element_type=jnp.float32) + b3_k

        # inverse_sigmoid(reference), eps = 1e-5 (DETR convention)
        eps = 1e-5
        r = r_ref[...]                                               # (tile_r, 4)
        rc = jnp.clip(r, 0.0, 1.0)
        ri = jnp.log(jnp.maximum(rc, eps)) - jnp.log(jnp.maximum(1.0 - rc, eps))

        logit_ref[...] = logits
        box_ref[...] = jax.nn.sigmoid(tmp + ri)                      # reference dim == 4 branch

    flops = int(2 * Rp * (D * (D + NC) + D * D + D * 4))
    bytes_accessed = int(4 * (Rp * D + Rp * 4 + (D + 1) * W + Rp * NC + Rp * 4))

    logits_p, coords_p = pl.pallas_call(
        head_kernel,
        out_shape=(jax.ShapeDtypeStruct((Rp, NC), jnp.float32),
                   jax.ShapeDtypeStruct((Rp, 4), jnp.float32)),
        grid=(tiles,),
        in_specs=[
            pl.BlockSpec((tile_r, D), lambda i: (i, 0)),
            pl.BlockSpec((tile_r, 4), lambda i: (i, 0)),
            pl.BlockSpec((D + 1, W), lambda i: (0, 0)),
        ],
        out_specs=[
            pl.BlockSpec((tile_r, NC), lambda i: (i, 0)),
            pl.BlockSpec((tile_r, 4), lambda i: (i, 0)),
        ],
        compiler_params=pltpu.CompilerParams(
            dimension_semantics=("parallel",),
            vmem_limit_bytes=32 * 1024 * 1024),
        cost_estimate=pl.CostEstimate(
            flops=flops, transcendentals=int(12 * Rp), bytes_accessed=bytes_accessed),
    )(h2, r2, pslab)

    logits = logits_p[:R].reshape(L, Bn, Q, NC)
    coords = coords_p[:R].reshape(L, Bn, Q, 4)
    return logits, coords


# ====================================================================
# Deterministic stubs for the external backbone / transformer modules
# ====================================================================
def backbone_stub(params, images):
    """images: NCHW [B,3,H,W] -> (feature NCHW [B,C_BB,H/2,W/2], mask, pos NCHW)."""
    Bn, Cn, Hn, Wn = images.shape
    x = images.reshape(Bn, Cn, Hn // 2, 2, Wn // 2, 2).mean(axis=(3, 5))      # [B,3,FH,FW]
    feat = jnp.einsum("bchw,cd->bdhw", x, params["backbone_proj"])            # [B,C_BB,FH,FW]
    mask = jnp.zeros((Bn, Hn // 2, Wn // 2), dtype=bool)
    pos = jnp.broadcast_to(params["pos_embed"], (Bn, HIDDEN, Hn // 2, Wn // 2))
    return feat, mask, pos


def transformer_stub(params, src, pos, query_embeds, prm):
    """src/pos/prm: [B, D, HW] (NCHW-flat); query_embeds: [Q, 2D]. Deterministic stand-in."""
    query_pos, tgt = jnp.split(query_embeds, 2, axis=1)                       # (Q, D) each
    memory = jnp.mean(src + pos, axis=2) + 0.01 * jnp.mean(prm, axis=2)       # (B, D)
    x = jnp.tanh(tgt)[None] + 0.0 * memory[:, None, :]                        # (B, Q, D)
    hs = []
    for _ in range(NUM_DEC_LAYERS):
        x = jnp.tanh(x + 0.1 * memory[:, None, :] + 0.05 * query_pos[None])
        hs.append(x)
    hs = jnp.stack(hs)                                                        # (L, B, Q, D)
    init_reference = jnp.broadcast_to(
        jax.nn.sigmoid(query_pos @ params["ref_proj"])[None], (src.shape[0], NUM_Q, 4))
    inter_references = jax.nn.sigmoid(jnp.einsum("lbqd,df->lbqf", hs, params["ref_proj"]))
    return hs, init_reference, inter_references


# ====================================================================
# PlainDETR forward (two_stage=False, with_box_refine=False, aux_loss=True)
# ====================================================================
def plain_detr_forward(params, samples, prompts):
    Bn = samples.shape[0]

    # --- backbone on samples and prompts ---
    src_nchw, mask, pos = backbone_stub(params, samples)
    prm_nchw, prm_mask, prm_pos = backbone_stub(params, prompts)

    # --- input_proj (Pallas): one merged call over samples + prompts,
    #     NCHW-flat layout (no transpose needed; lane axis = HW = 256) ---
    both_nchw = jnp.concatenate([src_nchw, prm_nchw], axis=0)                 # (2B, C_BB, FH, FW)
    both_ncp = both_nchw.reshape(2 * Bn, C_BB, HW)
    proj_slab = jnp.concatenate(
        [params["proj_w"].T, params["proj_b"], params["gn_gamma"], params["gn_beta"]],
        axis=1)                                                               # (D, C_BB+3)
    both_proj = input_proj(both_ncp, proj_slab)                               # (2B, D, HW)
    src_proj, prm_proj = both_proj[:Bn], both_proj[Bn:]

    # --- query embeddings (not two_stage) ---
    query_embeds = params["query_embed"][:NUM_Q]                              # (Q, 2D)

    # --- self-attention mask to prevent one2one <-> one2many leakage ---
    self_attn_mask = jnp.zeros((NUM_Q, NUM_Q), dtype=bool)
    self_attn_mask = self_attn_mask.at[NUM_Q_O2O:, :NUM_Q_O2O].set(True)
    self_attn_mask = self_attn_mask.at[:NUM_Q_O2O, NUM_Q_O2O:].set(True)

    pos_flat = pos.reshape(Bn, HIDDEN, HW)
    hs, init_reference, inter_references = transformer_stub(
        params, src_proj, pos_flat, query_embeds, prm_proj)

    # reference per level: lvl 0 -> init_reference, lvl > 0 -> inter_references[lvl-1]
    refs = jnp.concatenate(
        [init_reference[None], inter_references[:NUM_DEC_LAYERS - 1]], axis=0)  # (L, B, Q, 4)

    # --- per-level heads (Pallas), all levels in one invocation ---
    logits, coords = detection_heads(hs, refs, params)                        # (L,B,Q,NC), (L,B,Q,4)

    out = {
        "pred_logits": logits[-1, :, :NUM_Q_O2O],
        "pred_boxes": coords[-1, :, :NUM_Q_O2O],
        "pred_logits_one2many": logits[-1, :, NUM_Q_O2O:],
        "pred_boxes_one2many": coords[-1, :, NUM_Q_O2O:],
        "aux_outputs": [
            {"pred_logits": logits[l, :, :NUM_Q_O2O], "pred_boxes": coords[l, :, :NUM_Q_O2O]}
            for l in range(NUM_DEC_LAYERS - 1)
        ],
        "aux_outputs_one2many": [
            {"pred_logits": logits[l, :, NUM_Q_O2O:], "pred_boxes": coords[l, :, NUM_Q_O2O:]}
            for l in range(NUM_DEC_LAYERS - 1)
        ],
        "self_attn_mask": self_attn_mask,
    }
    return out


# ====================================================================
# Deterministic parameter init (mirrors PlainDETR.__init__ init rules)
# ====================================================================
def init_params(key):
    ks = jax.random.split(key, 10)
    bias_value = -math.log((1 - 0.01) / 0.01)         # prior_prob = 0.01

    # input_proj Conv2d(C_BB, HIDDEN, k=1): xavier_uniform weight, zero bias
    bound = math.sqrt(6.0 / (C_BB + HIDDEN))
    proj_w = jax.random.uniform(ks[0], (C_BB, HIDDEN), jnp.float32, -bound, bound)
    proj_b = jnp.zeros((HIDDEN, 1), jnp.float32)
    gn_gamma = jnp.ones((HIDDEN, 1), jnp.float32)     # GroupNorm affine
    gn_beta = jnp.zeros((HIDDEN, 1), jnp.float32)

    # class_embed Linear(HIDDEN, NUM_CLASSES): bias = -log((1-p)/p)
    lim = 1.0 / math.sqrt(HIDDEN)
    class_w = jax.random.uniform(ks[1], (HIDDEN, NUM_CLASSES), jnp.float32, -lim, lim)
    class_b = jnp.full((1, NUM_CLASSES), bias_value, jnp.float32)

    # bbox_embed MLP(HIDDEN, HIDDEN, 4, 3); last layer zeroed, bias[2:] = -2.0
    bbox_w1 = jax.random.uniform(ks[2], (HIDDEN, HIDDEN), jnp.float32, -lim, lim)
    bbox_b1 = jax.random.uniform(ks[3], (1, HIDDEN), jnp.float32, -lim, lim)
    bbox_w2 = jax.random.uniform(ks[4], (HIDDEN, HIDDEN), jnp.float32, -lim, lim)
    bbox_b2 = jax.random.uniform(ks[5], (1, HIDDEN), jnp.float32, -lim, lim)
    bbox_w3 = jnp.zeros((HIDDEN, 4), jnp.float32)
    bbox_b3 = jnp.zeros((1, 4), jnp.float32).at[0, 2:].set(-2.0)

    # query_embed Embedding(NUM_Q, 2*HIDDEN)
    query_embed = jax.random.normal(ks[6], (NUM_Q, 2 * HIDDEN), jnp.float32)

    # stub params (backbone / transformer placeholders)
    backbone_proj = jax.random.normal(ks[7], (IMG_C, C_BB), jnp.float32) * 0.1
    pos_embed = jax.random.normal(ks[8], (1, HIDDEN, FH, FW), jnp.float32) * 0.1
    ref_proj = jax.random.normal(ks[9], (HIDDEN, 4), jnp.float32) * 0.1

    return dict(proj_w=proj_w, proj_b=proj_b, gn_gamma=gn_gamma, gn_beta=gn_beta,
                class_w=class_w, class_b=class_b,
                bbox_w1=bbox_w1, bbox_b1=bbox_b1,
                bbox_w2=bbox_w2, bbox_b2=bbox_b2,
                bbox_w3=bbox_w3, bbox_b3=bbox_b3,
                query_embed=query_embed,
                backbone_proj=backbone_proj, pos_embed=pos_embed, ref_proj=ref_proj)


if __name__ == "__main__":
    key = jax.random.PRNGKey(0)
    pkey, skey, qkey = jax.random.split(key, 3)
    params = init_params(pkey)

    samples = jax.random.normal(skey, (B, IMG_C, IMG_H, IMG_W), jnp.float32)   # NCHW images
    prompts = jax.random.normal(qkey, (B, IMG_C, IMG_H, IMG_W), jnp.float32)   # NCHW prompt images

    out = plain_detr_forward(params, samples, prompts)
    jax.block_until_ready(out["pred_logits"])
    jax.block_until_ready(out["pred_boxes"])
    jax.block_until_ready(out["pred_logits_one2many"])
    jax.block_until_ready(out["pred_boxes_one2many"])

    assert out["pred_logits"].shape == (B, NUM_Q_O2O, NUM_CLASSES)
    assert out["pred_boxes"].shape == (B, NUM_Q_O2O, 4)
    assert out["pred_logits_one2many"].shape == (B, NUM_Q_O2M, NUM_CLASSES)
    assert out["pred_boxes_one2many"].shape == (B, NUM_Q_O2M, 4)
    assert len(out["aux_outputs"]) == NUM_DEC_LAYERS - 1
    assert bool(jnp.all(jnp.isfinite(out["pred_boxes"])))
    assert bool(jnp.all(jnp.isfinite(out["pred_logits"])))

    print("KERNEL_OK")
</pallas_src>

<mosaic_0001>
module attributes {stable_mosaic.version = 11 : i64} {
  func.func @input_proj_kernel(%arg0: i32, %arg1: memref<1x4x256xf32, #tpu.memory_space<vmem>>, %arg2: memref<32x7xf32, #tpu.memory_space<vmem>>, %arg3: memref<1x32x256xf32, #tpu.memory_space<vmem>>) attributes {dimension_semantics = [#tpu.dimension_semantics<parallel>], iteration_bounds = array<i64: 4>, scalar_prefetch = 0 : i64, scratch_operands = 0 : i64, tpu.core_type = #tpu.core_type<tc>, window_params = [{transform_indices = @transform_0, window_bounds = array<i64: 1, 4, 256>}, {pipeline_mode = #tpu.pipeline_mode<synchronous>, transform_indices = @transform_1, window_bounds = array<i64: 32, 7>}, {transform_indices = @transform_2, window_bounds = array<i64: 1, 32, 256>}]} {
    %c0 = arith.constant 0 : index
    %c0_0 = arith.constant 0 : index
    %c0_1 = arith.constant 0 : index
    %0 = vector.load %arg1[%c0, %c0_0, %c0_1] : memref<1x4x256xf32, #tpu.memory_space<vmem>>, vector<1x4x256xf32>
    %1 = vector.shape_cast %0 : vector<1x4x256xf32> to vector<4x256xf32>
    %c0_2 = arith.constant 0 : index
    %c0_3 = arith.constant 0 : index
    %2 = vector.load %arg2[%c0_2, %c0_3] : memref<32x7xf32, #tpu.memory_space<vmem>>, vector<32x7xf32>
    %3 = vector.extract_strided_slice %2 {offsets = [0, 0], sizes = [32, 4], strides = [1, 1]} : vector<32x7xf32> to vector<32x4xf32>
    %4 = vector.extract_strided_slice %2 {offsets = [0, 4], sizes = [32, 1], strides = [1, 1]} : vector<32x7xf32> to vector<32x1xf32>
    %5 = vector.extract_strided_slice %2 {offsets = [0, 5], sizes = [32, 1], strides = [1, 1]} : vector<32x7xf32> to vector<32x1xf32>
    %6 = vector.extract_strided_slice %2 {offsets = [0, 6], sizes = [32, 1], strides = [1, 1]} : vector<32x7xf32> to vector<32x1xf32>
    %7 = vector.extract_strided_slice %3 {offsets = [0, 0], sizes = [32, 1], strides = [1, 1]} : vector<32x4xf32> to vector<32x1xf32>
    %8 = vector.extract_strided_slice %1 {offsets = [0, 0], sizes = [1, 256], strides = [1, 1]} : vector<4x256xf32> to vector<1x256xf32>
    %9 = vector.broadcast %7 : vector<32x1xf32> to vector<32x256xf32>
    %10 = vector.broadcast %8 : vector<1x256xf32> to vector<32x256xf32>
    %11 = arith.mulf %9, %10 : vector<32x256xf32>
    %12 = vector.extract_strided_slice %3 {offsets = [0, 1], sizes = [32, 1], strides = [1, 1]} : vector<32x4xf32> to vector<32x1xf32>
    %13 = vector.extract_strided_slice %1 {offsets = [1, 0], sizes = [1, 256], strides = [1, 1]} : vector<4x256xf32> to vector<1x256xf32>
    %14 = vector.broadcast %12 : vector<32x1xf32> to vector<32x256xf32>
    %15 = vector.broadcast %13 : vector<1x256xf32> to vector<32x256xf32>
    %16 = arith.mulf %14, %15 : vector<32x256xf32>
    %17 = arith.addf %11, %16 : vector<32x256xf32>
    %18 = vector.extract_strided_slice %3 {offsets = [0, 2], sizes = [32, 1], strides = [1, 1]} : vector<32x4xf32> to vector<32x1xf32>
    %19 = vector.extract_strided_slice %1 {offsets = [2, 0], sizes = [1, 256], strides = [1, 1]} : vector<4x256xf32> to vector<1x256xf32>
    %20 = vector.broadcast %18 : vector<32x1xf32> to vector<32x256xf32>
    %21 = vector.broadcast %19 : vector<1x256xf32> to vector<32x256xf32>
    %22 = arith.mulf %20, %21 : vector<32x256xf32>
    %23 = arith.addf %17, %22 : vector<32x256xf32>
    %24 = vector.extract_strided_slice %3 {offsets = [0, 3], sizes = [32, 1], strides = [1, 1]} : vector<32x4xf32> to vector<32x1xf32>
    %25 = vector.extract_strided_slice %1 {offsets = [3, 0], sizes = [1, 256], strides = [1, 1]} : vector<4x256xf32> to vector<1x256xf32>
    %26 = vector.broadcast %24 : vector<32x1xf32> to vector<32x256xf32>
    %27 = vector.broadcast %25 : vector<1x256xf32> to vector<32x256xf32>
    %28 = arith.mulf %26, %27 : vector<32x256xf32>
    %29 = arith.addf %23, %28 : vector<32x256xf32>
    %30 = vector.broadcast %4 : vector<32x1xf32> to vector<32x256xf32>
    %31 = arith.addf %29, %30 : vector<32x256xf32>
    %cst = arith.constant dense<0.000000e+00> : vector<32xf32>
    %32 = vector.multi_reduction <add>, %31, %cst [1] : vector<32x256xf32> to vector<32xf32>
    %33 = vector.shape_cast %32 : vector<32xf32> to vector<32x1xf32>
    %34 = arith.mulf %31, %31 : vector<32x256xf32>
    %cst_4 = arith.constant dense<0.000000e+00> : vector<32xf32>
    %35 = vector.multi_reduction <add>, %34, %cst_4 [1] : vector<32x256xf32> to vector<32xf32>
    %36 = vector.shape_cast %35 : vector<32xf32> to vector<32x1xf32>
    %cst_5 = arith.constant 3.906250e-03 : f32
    %37 = vector.broadcast %cst_5 : f32 to vector<32x1xf32>
    %38 = arith.mulf %33, %37 : vector<32x1xf32>
    %cst_6 = arith.constant 3.906250e-03 : f32
    %39 = vector.broadcast %cst_6 : f32 to vector<32x1xf32>
    %40 = arith.mulf %36, %39 : vector<32x1xf32>
    %41 = arith.mulf %38, %38 : vector<32x1xf32>
    %42 = arith.subf %40, %41 : vector<32x1xf32>
    %cst_7 = arith.constant 0.000000e+00 : f32
    %43 = vector.broadcast %cst_7 : f32 to vector<32x1xf32>
    %44 = arith.maximumf %42, %43 : vector<32x1xf32>
    %45 = vector.broadcast %38 : vector<32x1xf32> to vector<32x256xf32>
    %46 = arith.subf %31, %45 : vector<32x256xf32>
    %cst_8 = arith.constant 9.99999974E-6 : f32
    %47 = vector.broadcast %cst_8 : f32 to vector<32x1xf32>
    %48 = arith.addf %44, %47 : vector<32x1xf32>
    %49 = math.rsqrt %48 : vector<32x1xf32>
    %50 = vector.broadcast %49 : vector<32x1xf32> to vector<32x256xf32>
    %51 = arith.mulf %46, %50 : vector<32x256xf32>
    %52 = vector.broadcast %5 : vector<32x1xf32> to vector<32x256xf32>
    %53 = arith.mulf %51, %52 : vector<32x256xf32>
    %54 = vector.broadcast %6 : vector<32x1xf32> to vector<32x256xf32>
    %55 = arith.addf %53, %54 : vector<32x256xf32>
    %c0_9 = arith.constant 0 : index
    %c0_10 = arith.constant 0 : index
    %c0_11 = arith.constant 0 : index
    %56 = vector.load %arg3[%c0_9, %c0_10, %c0_11] : memref<1x32x256xf32, #tpu.memory_space<vmem>>, vector<1x32x256xf32>
    %57 = vector.shape_cast %56 : vector<1x32x256xf32> to vector<32x256xf32>
    %58 = vector.shape_cast %55 : vector<32x256xf32> to vector<1x32x256xf32>
    tpu.vector_store %arg3[%c0_9, %c0_10, %c0_11], %58 {strides = array<i32>} : memref<1x32x256xf32, #tpu.memory_space<vmem>>, vector<1x32x256xf32>,
    return
  }
  func.func @transform_0(%arg0: i32) -> (i32, i32, i32) {
    %c0_i32 = arith.constant 0 : i32
    %c0_i32_0 = arith.constant 0 : i32
    %c0_i32_1 = arith.constant 0 : i32
    return %arg0, %c0_i32, %c0_i32_0 : i32, i32, i32
  }
  func.func @transform_1(%arg0: i32) -> (i32, i32) {
    %c0_i32 = arith.constant 0 : i32
    %c0_i32_0 = arith.constant 0 : i32
    %c0_i32_1 = arith.constant 0 : i32
    return %c0_i32, %c0_i32_0 : i32, i32
  }
  func.func @transform_2(%arg0: i32) -> (i32, i32, i32) {
    %c0_i32 = arith.constant 0 : i32
    %c0_i32_0 = arith.constant 0 : i32
    %c0_i32_1 = arith.constant 0 : i32
    return %arg0, %c0_i32, %c0_i32_0 : i32, i32, i32
  }
}

</mosaic_0001>

<bundles_post_ra>
// kernel: tpu_custom_call.1
= control target key start
LH: loop header
LB: loop body
LE: loop exit
PB: predicated region body
PF: predicated region fallthrough
CT: control target
= control target key end

     0   :  { %7 = vsyncpa [#allocation3], 0  ;;  %s971_s0 = inlined_call_operand.vmem [shape: f32[4,4,256], index: 0, kind: input, shape index: {}]   ;;  %s972_s1 = inlined_call_operand.vmem [shape: f32[32,7], index: 1, kind: input, shape index: {}]   ;;  %s973_s2 = inlined_call_operand.hbm [shape: f32[4,32,256], index: 2, kind: output, shape index: {}]  }
   0x1   :  { %9 = vsyncpa [#allocation3 + $0x1], 0  ;;  %s749_s9 = smov 0   ;;  %s751_s10 = smov 0  }
   0x2   :  { %s753_s11 = smov 0   ;;  %s755_s12 = smov 0  }
   0x3 LB: > { %s770_s13 = sadd.s32 4294967295, %s722_s12   ;;  %s576_s14 = sadd.s32 4294967294, %s722_s12   ;;  %s722_s12 = sphi %s755_s12, %s979_s12   ;;  %s718_s11 = sphi %s753_s11, %s978_s11   ;;  %s714_s10 = sphi %s751_s10, %s977_s10   ;;  %s710_s9 = sphi %s749_s9, %s976_s9  }
   0x4   : > { %s774_s15 = sadd.s32 1, %s722_s12   ;;  %s69_s16 = sadd.s32 1, %s718_s11 }
   0x5   : > { %s66_s17 = ssub.s32 %s722_s12, %s774_s15  ;;  %p79_p0 = scmp.ne.s32.totalorder %s718_s11, %s714_s10 }
   0x6   : > { %p67_p1 = scmp.eq.s32.totalorder %s66_s17, 0  ;;  %p80_p2 = scmp.eq.s32.totalorder %s770_s13, 3 }
   0x7   : > { %p85_p3 = scmp.ne.s32.totalorder %s714_s10, %s710_s9  ;;  %p86_p4 = scmp.eq.s32.totalorder %s576_s14, 3 }
   0x8   : > { %s785_s18 = scalar_select %p67_p1, %s718_s11, %s69_s16  }
   0x9   : > { %p787_p5 = por %p80_p2, %p79_p0  ;;  %p791_p6 = por %p86_p4, %p85_p3 }
   0xa   : > { %p579_p7 = scmp.ge.s32.totalorder %s722_s12, 1  ;;  %p115_p8 = scmp.lt.s32.totalorder %s722_s12, 5 }
   0xc   : > { %p116_p9 = pnand %p579_p7, %p115_p8 }
   0xd   : > { %v800_v0 = vld [vmem:[%s972_s1 + $0x10] sm:$0xff] (!%p116_p9)  ;;  %v805_v1 = vld [vmem:[%s972_s1] sm:$0xff] (!%p116_p9)  ;;  %v724_v2 = vmov (!%p116_p9), 0   ;;  %v812_v3 = vld [vmem:[%s972_s1 + $0x18] sm:$0xff] (!%p116_p9)  ;;  %v725_v5 = vmov (!%p116_p9), 1   ;;  %v726_v6 = vmov (!%p116_p9), 2   ;;  %v168_v14 = vlaneseq (!%p116_p9) }
   0xe   : > { %119 = sbr.rel (%p116_p9) target bundleno = 385 (0x181), region = 28  ;;  %639 = vset.pattern.permute.xlu1 (!%p116_p9), %v724_v2  ;;  %638 = vset.pattern.permute.xlu0 (!%p116_p9), %v724_v2  ;;  %v817_v4 = vld [vmem:[%s972_s1 + $0x8] sm:$0xff] (!%p116_p9)  ;;  %v727_v7 = vmov (!%p116_p9), 3   ;;  %v728_v8 = vmov (!%p116_p9), 4   ;;  %v729_v9 = vmov (!%p116_p9), 5   ;;  %p137_p10 = scmp.lt.s32.totalorder (!%p116_p9), %s770_s13, 3 }
   0xf   : > { %159 = vperm.xlu1 (!%p116_p9), %639, %v800_v0   ;;  %149 = vperm.xlu0 (!%p116_p9), %638, %v805_v1   ;;  %v169_v17 = vshrl.u32 (!%p116_p9), %v168_v14, 7  ;;  %s134_s6 = sand.u32 (!%p116_p9), 1, %s714_s10   ;;  %s589_s14 = sshll.u32 (!%p116_p9), %s770_s13, 10 }
  0x10   : > { %s580_s7 = sshll.u32 (!%p116_p9), %s134_s6, 6  ;;  %s922_s22 = scalar_lea.hbm (!%p116_p9), %s973_s2, %s589_s14 }
  0x11   : > { %v212_v20 = vsub.s32 (!%p116_p9), 1, %v169_v17  ;;  %v216_v21 = vsub.s32 (!%p116_p9), 5, %v169_v17  ;;  %v170_v22 = vsub.s32 (!%p116_p9), 0, %v169_v17  ;;  %v174_v23 = vsub.s32 (!%p116_p9), 4, %v169_v17  ;;  %s905_s8 = scalar_lea.vmem (!%p116_p9), [#allocation2], %s580_s7  ;;  %s731_s24 = smov (!%p116_p9), [#allocation2]  }
  0x12   : > { %v262_v24 = vsub.s32 (!%p116_p9), 2, %v169_v17  ;;  %v266_v25 = vsub.s32 (!%p116_p9), 6, %v169_v17  ;;  %v312_v35 = vsub.s32 (!%p116_p9), 3, %v169_v17  ;;  %v316_v36 = vsub.s32 (!%p116_p9), 7, %v169_v17  ;;  %s514_s16 = sshll.u32 (!%p116_p9), %s905_s8, 4  ;;  %s664_s25 = sshll.u32 (!%p116_p9), %s731_s24, 4  ;;  %s924_s16 = int_to_ptr.vmem [resolvable:$true] %s514_s16  ;;  %s665_s25 = int_to_ptr.vmem [resolvable:$false] %s664_s25 }
  0x13   : > { %164 = vperm.xlu1 (!%p116_p9), %639, %v812_v3   ;;  %154 = vperm.xlu0 (!%p116_p9), %638, %v817_v4   ;;  %s660_s23 = scalar_lea.vmem (!%p116_p9), %s924_s16, 1024  ;;  %s666_s26 = scalar_lea.vmem (!%p116_p9), %s665_s25, 2048 }
  0x14   : > { %p661_p11 = scmp.ne.s32.totalorder (!%p116_p9), %s924_s16, %s660_s23  ;;  %p667_p0 = scmp.lt.s32.totalorder (!%p116_p9), %s924_s16, %s665_s25 }
  0x15   : > { %s138_s29 = scalar_select %p137_p10, %s770_s13, 3 }
  0x16   : > { %s930_s13 = scalar_lea.sflag [#allocation3], %s134_s6  ;;  %p662_p12 = pnand %p661_p11, %p787_p5 }
  0x17   : > { %641 = vset.pattern.permute.xlu1 %v725_v5  ;;  %640 = vset.pattern.permute.xlu0 %v725_v5  ;;  %s588_s30 = sshll.u32 %s138_s29, 3  ;;  %p668_p1 = scmp.lt.s32.totalorder %s666_s26, %s660_s23 }
  0x18   : > { %199 = vperm.xlu1 %641, %v817_v4   ;;  %195 = vperm.xlu0 %640, %v805_v1   ;;  %s141_s5 = scalar_lea.vmem %s971_s0, %s588_s30  ;;  %p663_p13 = pneg %p662_p12 }
  0x19   : > { %v142_v26 = vld [vmem:[%s141_s5] sm:$0xff]  ;;  %p669_p2 = por %p668_p1, %p667_p0 }
  0x1a   : > { %v213_v27 = vrot.slane %v142_v26, %v212_v20  ;;  %v217_v28 = vrot.slane %v142_v26, %v216_v21  ;;  %v171_v31 = vrot.slane %v142_v26, %v170_v22  ;;  %v175_v32 = vrot.slane %v142_v26, %v174_v23 }
  0x1b   : > { %v263_v33 = vrot.slane %v142_v26, %v262_v24  ;;  %v267_v34 = vrot.slane %v142_v26, %v266_v25  ;;  %v313_v45 = vrot.slane %v142_v26, %v312_v35  ;;  %v317_v46 = vrot.slane %v142_v26, %v316_v36  ;;  %p670_p3 = pnand %p669_p2, %p663_p13 }
  0x1c   : > { %203 = vperm.xlu1 %641, %v800_v0   ;;  %207 = vperm.xlu0 %640, %v812_v3   ;;  %v223_v37 = vrot.slane %v213_v27, %v212_v20  ;;  %v227_v38 = vrot.slane %v217_v28, %v212_v20  ;;  %v181_v41 = vrot.slane %v171_v31, %v170_v22 }
  0x1d   : > { %v185_v42 = vrot.slane %v175_v32, %v170_v22  ;;  %v273_v43 = vrot.slane %v263_v33, %v262_v24  ;;  %v277_v44 = vrot.slane %v267_v34, %v262_v24  ;;  %v323_v56 = vrot.slane %v313_v45, %v312_v35 }
  0x1e   : > { %v327_v57 = vrot.slane %v317_v46, %v312_v35 }
  0x20   : > { %642 = vset.pattern.permute.xlu1 %v726_v6  ;;  %643 = vset.pattern.permute.xlu0 %v726_v6 }
  0x21   : > { %245 = vperm.xlu1 %642, %v805_v1   ;;  %249 = vperm.xlu0 %643, %v817_v4  }
  0x25   : > { %253 = vperm.xlu1 %642, %v800_v0   ;;  %644 = vset.pattern.permute.xlu0 %v727_v7 }
  0x26   : > { %295 = vperm.xlu0 %644, %v805_v1  }
  0x29   : > { %257 = vperm.xlu1 %642, %v812_v3  }
  0x2a   : > { %307 = vperm.xlu0 %644, %v812_v3  }
  0x2d   : > { %645 = vset.pattern.permute.xlu1 %v727_v7 }
  0x2e   : > { %299 = vperm.xlu1 %645, %v817_v4   ;;  %647 = vset.pattern.permute.xlu0 %v728_v8 }
  0x2f   : > { %349 = vperm.xlu0 %647, %v817_v4  }
  0x32   : > { %303 = vperm.xlu1 %645, %v800_v0  }
  0x33   : > { %649 = vset.pattern.permute.xlu0 %v729_v9 }
  0x36   : > { %646 = vset.pattern.permute.xlu1 %v728_v8 }
  0x37   : > { %345 = vperm.xlu1 %646, %v805_v1  }
  0x3b   : > { %353 = vperm.xlu1 %646, %v800_v0  }
  0x3f   : > { %357 = vperm.xlu1 %646, %v812_v3  }
  0x43   : > { %648 = vset.pattern.permute.xlu1 %v729_v9 }
  0x44   : > { %445 = vperm.xlu1 %648, %v805_v1  }
  0x8e   : > { %v160_v10 = vpop.permute.xlu1 %159  ;;  %v150_v11 = vpop.permute.xlu0 %149 }
  0x8f   : > { %v186_v54 = vmul.f32 %v181_v41, %v150_v11  ;;  %v187_v55 = vmul.f32 %v185_v42, %v150_v11  ;;  %v190_v63 = vmul.f32 %v181_v41, %v160_v10  ;;  %v191_v2 = vmul.f32 %v185_v42, %v160_v10 }
  0x92   : > { %v165_v12 = vpop.permute.xlu1 %164  ;;  %v155_v13 = vpop.permute.xlu0 %154 }
  0x93   : > { %v188_v47 = vmul.f32 %v181_v41, %v155_v13  ;;  %v189_v48 = vmul.f32 %v185_v42, %v155_v13  ;;  %v192_v5 = vmul.f32 %v181_v41, %v165_v12  ;;  %v193_v14 = vmul.f32 %v185_v42, %v165_v12 }
  0x97   : > { %v200_v15 = vpop.permute.xlu1 %199  ;;  %v196_v16 = vpop.permute.xlu0 %195 }
  0x98   : > { %v230_v49 = vmul.f32 %v223_v37, %v200_v15  ;;  %v231_v50 = vmul.f32 %v227_v38, %v200_v15  ;;  %v228_v61 = vmul.f32 %v223_v37, %v196_v16  ;;  %v229_v62 = vmul.f32 %v227_v38, %v196_v16 }
  0x9a   : > { %v238_v59 = vadd.f32 %v230_v49, %v188_v47  ;;  %v239_v60 = vadd.f32 %v231_v50, %v189_v48  ;;  %v236_v21 = vadd.f32 %v228_v61, %v186_v54  ;;  %v237_v22 = vadd.f32 %v229_v62, %v187_v55 }
  0x9b   : > { %v840_v18 = vpop.permute.xlu1 %203  ;;  %v842_v19 = vpop.permute.xlu0 %207 }
  0x9c   : > { %v232_v15 = vmul.f32 %v223_v37, %v840_v18  ;;  %v233_v16 = vmul.f32 %v227_v38, %v840_v18  ;;  %v234_v10 = vmul.f32 %v223_v37, %v842_v19  ;;  %v235_v28 = vmul.f32 %v227_v38, %v842_v19 }
  0x9e   : > { %v241_v37 = vadd.f32 %v233_v16, %v191_v2  ;;  %v242_v19 = vadd.f32 %v234_v10, %v192_v5  ;;  %v243_v38 = vadd.f32 %v235_v28, %v193_v14 }
  0xa0   : > { %v246_v29 = vpop.permute.xlu1 %245  ;;  %v250_v30 = vpop.permute.xlu0 %249 }
  0xa1   : > { %v280_v52 = vmul.f32 %v273_v43, %v250_v30  ;;  %v281_v53 = vmul.f32 %v277_v44, %v250_v30  ;;  %v278_v17 = vmul.f32 %v273_v43, %v246_v29  ;;  %v279_v11 = vmul.f32 %v277_v44, %v246_v29 }
  0xa2   : > { %v240_v29 = vadd.f32 %v232_v15, %v190_v63 }
  0xa3   : > { %v288_v7 = vadd.f32 %v280_v52, %v238_v59  ;;  %v289_v8 = vadd.f32 %v281_v53, %v239_v60  ;;  %v286_v32 = vadd.f32 %v278_v17, %v236_v21  ;;  %v287_v33 = vadd.f32 %v279_v11, %v237_v22 }
  0xa4   : > { %v254_v39 = vpop.permute.xlu1 %253  ;;  %v730_v22 = vmov 6  }
  0xa5   : > { %v296_v40 = vpop.permute.xlu0 %295  ;;  %v282_v30 = vmul.f32 %v273_v43, %v254_v39  ;;  %v283_v34 = vmul.f32 %v277_v44, %v254_v39 }
  0xa6   : > { %v328_v25 = vmul.f32 %v323_v56, %v296_v40  ;;  %v329_v26 = vmul.f32 %v327_v57, %v296_v40 }
  0xa7   : > { %v290_v46 = vadd.f32 %v282_v30, %v240_v29  ;;  %v291_v48 = vadd.f32 %v283_v34, %v241_v37 }
  0xa8   : > { %v258_v51 = vpop.permute.xlu1 %257  ;;  %v336_v42 = vadd.f32 %v328_v25, %v286_v32  ;;  %v337_v45 = vadd.f32 %v329_v26, %v287_v33 }
  0xa9   : > { %v308_v58 = vpop.permute.xlu0 %307  ;;  %v284_v35 = vmul.f32 %v273_v43, %v258_v51  ;;  %v285_v36 = vmul.f32 %v277_v44, %v258_v51 }
  0xaa   : > { %v334_v49 = vmul.f32 %v323_v56, %v308_v58  ;;  %v335_v51 = vmul.f32 %v327_v57, %v308_v58 }
  0xab   : > { %v292_v43 = vadd.f32 %v284_v35, %v242_v19  ;;  %v293_v44 = vadd.f32 %v285_v36, %v243_v38 }
  0xad   : > { %v300_v6 = vpop.permute.xlu1 %299  ;;  %v342_v63 = vadd.f32 %v334_v49, %v292_v43 }
  0xae   : > { %v330_v9 = vmul.f32 %v323_v56, %v300_v6  ;;  %v331_v13 = vmul.f32 %v327_v57, %v300_v6  ;;  %v350_v20 = vpop.permute.xlu0 %349 }
  0xb0   : > { %v338_v23 = vadd.f32 %v330_v9, %v288_v7  ;;  %v339_v24 = vadd.f32 %v331_v13, %v289_v8 }
  0xb1   : > { %v304_v27 = vpop.permute.xlu1 %303 }
  0xb2   : > { %v851_v12 = vadd.f32 %v350_v20, %v338_v23  ;;  %v853_v31 = vadd.f32 %v350_v20, %v339_v24  ;;  %v332_v41 = vmul.f32 %v323_v56, %v304_v27  ;;  %v333_v40 = vmul.f32 %v327_v57, %v304_v27 }
  0xb3   : > { %v343_v57 = vadd.f32 %v335_v51, %v293_v44 }
  0xb4   : > { %v371_v18 = vadd.f32 %v853_v31, %v851_v12  ;;  %v340_v52 = vadd.f32 %v332_v41, %v290_v46  ;;  %v341_v53 = vadd.f32 %v333_v40, %v291_v48  ;;  %v382_v14 = vmul.f32 %v851_v12, %v851_v12 }
  0xb5   : > { %v383_v15 = vmul.f32 %v853_v31, %v853_v31 }
  0xb6   : > { %v346_v47 = vpop.permute.xlu1 %345  ;;  %372 = vadd.xlane.f32.xlu1 %v371_v18 }
  0xb7   : > { %v857_v50 = vadd.f32 %v346_v47, %v336_v42  ;;  %v859_v39 = vadd.f32 %v346_v47, %v337_v45  ;;  %v391_v17 = vadd.f32 %v383_v15, %v382_v14 }
  0xb9   : > { %v368_v54 = vadd.f32 %v859_v39, %v857_v50  ;;  %v380_v55 = vmul.f32 %v857_v50, %v857_v50  ;;  %v381_v59 = vmul.f32 %v859_v39, %v859_v39 }
  0xba   : > { %v354_v60 = vpop.permute.xlu1 %353 }
  0xbb   : > { %v867_v56 = vadd.f32 %v354_v60, %v340_v52  ;;  %v869_v61 = vadd.f32 %v354_v60, %v341_v53  ;;  %369 = vadd.xlane.f32.xlu0 %v368_v54  ;;  %v388_v62 = vadd.f32 %v381_v59, %v380_v55 }
  0xbd   : > { %389 = vadd.xlane.f32.xlu1 %v388_v62  ;;  %v374_v58 = vadd.f32 %v869_v61, %v867_v56  ;;  %v384_v2 = vmul.f32 %v867_v56, %v867_v56  ;;  %v385_v5 = vmul.f32 %v869_v61, %v869_v61 }
  0xbe   : > { %v358_v6 = vpop.permute.xlu1 %357 }
  0xbf   : > { %v877_v7 = vadd.f32 %v358_v6, %v342_v63  ;;  %v879_v8 = vadd.f32 %v358_v6, %v343_v57  ;;  %375 = vadd.xlane.f32.xlu0 %v374_v58  ;;  %v394_v9 = vadd.f32 %v385_v5, %v384_v2 }
  0xc1   : > { %395 = vadd.xlane.f32.xlu1 %v394_v9  ;;  %v377_v13 = vadd.f32 %v879_v8, %v877_v7  ;;  %v386_v11 = vmul.f32 %v877_v7, %v877_v7  ;;  %v387_v20 = vmul.f32 %v879_v8, %v879_v8 }
  0xc3   : > { %378 = vadd.xlane.f32.xlu0 %v377_v13  ;;  %v397_v21 = vadd.f32 %v387_v20, %v386_v11  ;;  %v446_v23 = vpop.permute.xlu1 %445 }
  0xc7   : > { %392 = vadd.xlane.f32.xlu0 %v391_v17 }
  0xcb   : > { %398 = vadd.xlane.f32.xlu0 %v397_v21 }
  0xd2   : > { %453 = vperm.xlu1 %648, %v800_v0  }
  0xd6   : > { %457 = vperm.xlu1 %648, %v812_v3  }
  0xda   : > { %650 = vset.pattern.permute.xlu1 %v730_v22 }
  0xdb   : > { %469 = vperm.xlu1 %650, %v805_v1  }
  0xdf   : > { %473 = vperm.xlu1 %650, %v817_v4  }
  0xe1   : > { %449 = vperm.xlu0 %649, %v817_v4  }
  0xe3   : > { %477 = vperm.xlu1 %650, %v800_v0  }
  0xe5   : > { %651 = vset.pattern.permute.xlu0 %v730_v22 }
  0xe7   : > { %481 = vperm.xlu1 %650, %v812_v3  }
 0x143   : > { %v373_v24 = vpop.xlane.xlu1 %372 }
 0x144   : > { %v401_v35 = vmul.f32 0.00390625, %v373_v24 }
 0x146   : > { %v409_v40 = vmul.f32 %v401_v35, %v401_v35 }
 0x148   : > { %v370_v16 = vpop.xlane.xlu0 %369 }
 0x149   : > { %v400_v10 = vmul.f32 0.00390625, %v370_v16 }
 0x14a   : > { %v390_v25 = vpop.xlane.xlu1 %389 }
 0x14b   : > { %v404_v26 = vmul.f32 0.00390625, %v390_v25  ;;  %v408_v27 = vmul.f32 %v400_v10, %v400_v10  ;;  %v420_v52 = vsub.f32 %v857_v50, %v400_v10  ;;  %v421_v53 = vsub.f32 %v859_v39, %v400_v10 }
 0x14c   : > { %v376_v28 = vpop.xlane.xlu0 %375 }
 0x14d   : > { %v412_v30 = vsub.f32 %v404_v26, %v408_v27  ;;  %v402_v29 = vmul.f32 0.00390625, %v376_v28 }
 0x14e   : > { %v396_v1 = vpop.xlane.xlu1 %395 }
 0x14f   : > { %v416_v32 = vmax.f32 %v412_v30, 0.0  ;;  %v406_v33 = vmul.f32 0.00390625, %v396_v1  ;;  %v410_v34 = vmul.f32 %v402_v29, %v402_v29  ;;  %v424_v2 = vsub.f32 %v867_v56, %v402_v29 }
 0x150   : > { %v379_v4 = vpop.xlane.xlu0 %378  ;;  %v425_v5 = vsub.f32 %v869_v61, %v402_v29  ;;  %v422_v56 = vsub.f32 %v851_v12, %v401_v35  ;;  %v423_v61 = vsub.f32 %v853_v31, %v401_v35 }
 0x151   : > { %v428_v0 = vadd.f32 1e-05, %v416_v32  ;;  %v414_v36 = vsub.f32 %v406_v33, %v410_v34  ;;  %v403_v37 = vmul.f32 0.00390625, %v379_v4 }
 0x152   : > { %v454_v41 = vpop.permute.xlu1 %453 }
 0x153   : > { %652 = vrsqrt.f32 %v428_v0  ;;  %v418_v3 = vmax.f32 %v414_v36, 0.0  ;;  %v411_v48 = vmul.f32 %v403_v37, %v403_v37  ;;  %v426_v16 = vsub.f32 %v877_v7, %v403_v37 }
 0x154   : > { %v393_v18 = vpop.xlane.xlu0 %392  ;;  %v427_v10 = vsub.f32 %v879_v8, %v403_v37 }
 0x155   : > { %v405_v42 = vmul.f32 0.00390625, %v393_v18  ;;  %v430_v45 = vadd.f32 1e-05, %v418_v3 }
 0x156   : > { %v458_v19 = vpop.permute.xlu1 %457 }
 0x157   : > { %v413_v38 = vsub.f32 %v405_v42, %v409_v40  ;;  %654 = vrsqrt.f32 %v430_v45 }
 0x158   : > { %v399_v46 = vpop.xlane.xlu0 %398 }
 0x159   : > { %v417_v47 = vmax.f32 %v413_v38, 0.0  ;;  %v407_v49 = vmul.f32 0.00390625, %v399_v46 }
 0x15a   : > { %v470_v43 = vpop.permute.xlu1 %469 }
 0x15b   : > { %v429_v44 = vadd.f32 1e-05, %v417_v47  ;;  %v415_v51 = vsub.f32 %v407_v49, %v411_v48 }
 0x15d   : > { %v653_v54 = vpop.eup %652  ;;  %656 = vrsqrt.f32 %v429_v44  ;;  %v419_v55 = vmax.f32 %v415_v51, 0.0 }
 0x15e   : > { %v436_v59 = vmul.f32 %v653_v54, %v420_v52  ;;  %v437_v60 = vmul.f32 %v653_v54, %v421_v53  ;;  %v474_v58 = vpop.permute.xlu1 %473 }
 0x15f   : > { %v431_v62 = vadd.f32 1e-05, %v419_v55 }
 0x160   : > { %v460_v63 = vmul.f32 %v446_v23, %v436_v59  ;;  %v461_v57 = vmul.f32 %v446_v23, %v437_v60  ;;  %v450_v22 = vpop.permute.xlu0 %449 }
 0x161   : > { %658 = vrsqrt.f32 %v431_v62  ;;  %v655_v6 = vpop.eup %654 }
 0x162   : > { %v484_v50 = vadd.f32 %v470_v43, %v460_v63  ;;  %v485_v9 = vadd.f32 %v470_v43, %v461_v57  ;;  %v440_v39 = vmul.f32 %v655_v6, %v424_v2  ;;  %v441_v13 = vmul.f32 %v655_v6, %v425_v5  ;;  %v478_v17 = vpop.permute.xlu1 %477 }
 0x164   : > { %492 = vst [vmem:[%s905_s8] sm:$0xff] %v484_v50  ;;  %493 = vst [vmem:[%s905_s8 + $0x8] sm:$0xff] %v485_v9  ;;  %v464_v14 = vmul.f32 %v454_v41, %v440_v39  ;;  %v465_v15 = vmul.f32 %v454_v41, %v441_v13 }
 0x166   : > { %v488_v20 = vadd.f32 %v478_v17, %v464_v14  ;;  %v489_v21 = vadd.f32 %v478_v17, %v465_v15  ;;  %v482_v7 = vpop.permute.xlu1 %481 }
 0x167   : > { %v657_v11 = vpop.eup %656 }
 0x168   : > { %v438_v23 = vmul.f32 %v657_v11, %v422_v56  ;;  %v439_v24 = vmul.f32 %v657_v11, %v423_v61  ;;  %496 = vst [vmem:[%s905_s8 + $0x20] sm:$0xff] %v488_v20  ;;  %497 = vst [vmem:[%s905_s8 + $0x28] sm:$0xff] %v489_v21 }
 0x16a   : > { %v462_v25 = vmul.f32 %v450_v22, %v438_v23  ;;  %v463_v12 = vmul.f32 %v450_v22, %v439_v24 }
 0x16b   : > { %v659_v26 = vpop.eup %658 }
 0x16c   : > { %v442_v31 = vmul.f32 %v659_v26, %v426_v16  ;;  %v443_v27 = vmul.f32 %v659_v26, %v427_v10  ;;  %v486_v28 = vadd.f32 %v474_v58, %v462_v25  ;;  %v487_v30 = vadd.f32 %v474_v58, %v463_v12 }
 0x16e   : > { %v466_v29 = vmul.f32 %v458_v19, %v442_v31  ;;  %v467_v1 = vmul.f32 %v458_v19, %v443_v27  ;;  %494 = vst [vmem:[%s905_s8 + $0x10] sm:$0xff] %v486_v28  ;;  %495 = vst [vmem:[%s905_s8 + $0x18] sm:$0xff] %v487_v30 }
 0x170   : > { %v490_v8 = vadd.f32 %v482_v7, %v466_v29  ;;  %v491_v32 = vadd.f32 %v482_v7, %v467_v1 }
 0x172   : > { %498 = vst [vmem:[%s905_s8 + $0x30] sm:$0xff] %v490_v8  ;;  %499 = vst [vmem:[%s905_s8 + $0x38] sm:$0xff] %v491_v32 }
 0x173   : > { %673 = shalt.err (!%p670_p3)
}
 0x174   : > { %s674_s27 = scalar_lea.hbm %s922_s22, 1024  ;;  %s678_s30 = scalar_lea.hbm %s973_s2, 4096 }
 0x175   : > { %p675_p4 = scmp.ne.s32.totalorder %s922_s22, %s674_s27  ;;  %p679_p9 = scmp.lt.u32.totalorder %s922_s22, %s973_s2 }
 0x176   : > { %p680_p10 = scmp.lt.u32.totalorder %s678_s30, %s674_s27  ;;  %p682_p12 = scmp.lt.u32.totalorder %s674_s27, %s922_s22 }
 0x177   : > { %p676_p7 = pnand %p675_p4, %p787_p5 }
 0x178   : > { %p681_p11 = por %p680_p10, %p679_p9 }
 0x179   : > { %p677_p8 = pneg %p676_p7 }
 0x17a   : > { %p683_p13 = por %p682_p12, %p681_p11 }
 0x17c   : > { %p684_p0 = pnand %p683_p13, %p677_p8 }
 0x17e   : > { %687 = shalt.err (!%p684_p0)
}
 0x17f   : > { %s732_s5 = smov 256   ;;  %s733_s6 = smov 16  }
 0x180   : > { %590 = dma.vmem_to_hbm [thread:$0]  (%p787_p5), %s924_s16, 1024, %s922_s22, %s930_s13, %s732_s5, %s732_s5, %s733_s6  }
 0x181 PF: > { %p596_p1 = scmp.ge.s32.totalorder %s722_s12, 2  ;;  %s529_s7 = sand.u32 1, %s710_s9  }
 0x182   : > { %s530_s8 = scalar_lea.sflag [#allocation3], %s529_s7 }
 0x183   : > { %p593_p2 = pnand %p596_p1, %p791_p6 }
 0x185   : > { %705 = dma.done.wait (!%p593_p2), %s530_s8, 1024  }
 0x186   : > { %707 = vsyncadd (!%p593_p2), %s530_s8, 4294966272  ;;  %p12_p3 = scmp.ge.s32.totalorder %s774_s15, 6   ;;  %s976_s9 = smov %s714_s10 }
 0x187   : > { %s977_s10 = smov %s718_s11  ;;  %s978_s11 = smov %s785_s18 }
 0x188   : > { %s979_s12 = smov %s774_s15  ;;  %14 = sbr.rel (!%p12_p3) target bundleno = 3 (0x3), region = 63 }
 0x18f   :  { %535 = vsyncpa [#allocation3], 1 }
 0x190   :  { %537 = vsyncpa [#allocation3 + $0x1], 1 }

</bundles_post_ra>
